<compile_context>
chip_gen: v7x
topology: tpu7x:2x2x1
jax: 0.10.0
libtpu: 0.0.40
codegen_flags: <defaults>
</compile_context>

<pallas_src>
import jax
import jax.numpy as jnp
from jax.experimental import pallas as pl
from jax.experimental.pallas import tpu as pltpu


_SQRT_HALF = 0.7071067811865476


def _round_up(x, m):
    return ((x + m - 1) // m) * m


# ---------------------------------------------------------------------------
# Pallas kernel: fused  CLS @ W1 + b1 -> GELU(exact) -> linear_2
# Shapes seen by the kernel (per grid step):
#   cls_ref : (TB, D)   bf16/f32
#   w1_ref  : (D, Hp)   bf16/f32   (grid-invariant)
#   b1_ref  : (1, Hp)   f32        (grid-invariant)
#   w2_ref  : (1, Hp) f32 if C==1 (transposed row)  else (Hp, C) f32
#   b2_ref  : (1, C)    f32        (grid-invariant)
#   out_ref : (TB, C)   f32
# ---------------------------------------------------------------------------
def _bert_head_kernel(cls_ref, w1_ref, b1_ref, w2_ref, b2_ref, out_ref):
    x = cls_ref[...]
    # linear_1 on the MXU, f32 accumulation.
    h = jnp.dot(x, w1_ref[...], preferred_element_type=jnp.float32) + b1_ref[...]
    # Exact (erf-based) GELU == torch.nn.GELU(approximate='none').  erf -> EUP.
    h = 0.5 * h * (1.0 + jax.lax.erf(h * _SQRT_HALF))
    # nn.Dropout(p=0.1) is identity in eval mode.
    if out_ref.shape[-1] == 1:
        # linear_2 with C==1: VPU multiply + cross-lane (XLU) reduce; skips a
        # degenerate K=H, N=1 MXU matmul entirely.
        out = jnp.sum(h * w2_ref[...], axis=-1, keepdims=True) + b2_ref[...]
    else:
        out = jnp.dot(h, w2_ref[...], preferred_element_type=jnp.float32) + b2_ref[...]
    # Note: C==1 output means masked lane stores; acceptable at this size.
    out_ref[...] = out


def bert_head(cls_vec, w1, b1, w2, b2, *, block_b=128,
              compute_dtype=jnp.bfloat16):
    """Fused classification head.  cls_vec: (B, D) -> (B, C) f32."""
    B, D = cls_vec.shape
    H = w1.shape[1]
    C = w2.shape[1]

    # --- pad hidden dim to a lane multiple (exact; see header comment) ------
    Hp = max(_round_up(H, 128), 128)
    if Hp != H:
        w1 = jnp.pad(w1, ((0, 0), (0, Hp - H)))
        b1 = jnp.pad(b1, (0, Hp - H))
        w2 = jnp.pad(w2, ((0, Hp - H), (0, 0)))

    # --- tile the batch ------------------------------------------------------
    TB = min(block_b, _round_up(B, 8))
    Bp = _round_up(B, TB)
    if Bp != B:
        cls_vec = jnp.pad(cls_vec, ((0, Bp - B), (0, 0)))
    grid = (Bp // TB,)

    x = cls_vec.astype(compute_dtype)
    w1c = w1.astype(compute_dtype)
    b1_2d = b1.reshape(1, Hp).astype(jnp.float32)
    b2_2d = b2.reshape(1, C).astype(jnp.float32)
    if C == 1:
        # Transposed weight row for the broadcast-multiply + reduce path.
        w2_arg = w2.reshape(1, Hp).astype(jnp.float32)
        w2_spec = pl.BlockSpec((1, Hp), lambda i: (0, 0))
    else:
        w2_arg = w2.astype(jnp.float32)
        w2_spec = pl.BlockSpec((Hp, C), lambda i: (0, 0))

    itemsize = jnp.dtype(compute_dtype).itemsize
    cost = pl.CostEstimate(
        flops=2 * Bp * D * Hp + 12 * Bp * Hp + 2 * Bp * Hp * C,
        transcendentals=Bp * Hp,
        bytes_accessed=(Bp * D * itemsize + D * Hp * itemsize
                        + 4 * Hp + 4 * Hp * C + 4 * C + 4 * Bp * C),
    )

    out = pl.pallas_call(
        _bert_head_kernel,
        out_shape=jax.ShapeDtypeStruct((Bp, C), jnp.float32),
        grid_spec=pl.GridSpec(
            grid=grid,
            in_specs=[
                pl.BlockSpec((TB, D), lambda i: (i, 0)),   # CLS tile (pipelined)
                pl.BlockSpec((D, Hp), lambda i: (0, 0)),   # W1 (grid-invariant)
                pl.BlockSpec((1, Hp), lambda i: (0, 0)),   # b1
                w2_spec,                                   # W2 (row or matrix)
                pl.BlockSpec((1, C), lambda i: (0, 0)),    # b2
            ],
            out_specs=pl.BlockSpec((TB, C), lambda i: (i, 0)),
        ),
        compiler_params=pltpu.CompilerParams(
            dimension_semantics=("parallel",)),            # dual-TC on v7x
        cost_estimate=cost,
    )(x, w1c, b1_2d, w2_arg, b2_2d)

    return out[:B]


# ---------------------------------------------------------------------------
# Frozen backbone stub (plain JAX glue).
# TODO(synk): the real HF BERT backbone is an external frozen module; it is
# replaced by a deterministic embedding lookup.  Only the CLS row is gathered,
# so no (B, S, D) last_hidden_state is ever materialized.
# ---------------------------------------------------------------------------
def backbone_cls_stub(token_ids, attn_mask, emb_table):
    cls = jnp.take(emb_table, token_ids[:, 0], axis=0)            # (B, D)
    cls = cls * attn_mask[:, :1].astype(cls.dtype)                # CLS mask is 1
    return cls


def bert_model_forward(token_ids, attn_mask, params,
                       compute_dtype=jnp.bfloat16):
    cls_vec = backbone_cls_stub(token_ids, attn_mask, params["emb"])
    return bert_head(cls_vec, params["w1"], params["b1"],
                     params["w2"], params["b2"],
                     compute_dtype=compute_dtype)


# ---------------------------------------------------------------------------
# Reference (pure JAX), using the identical bf16 quantization of x and W1.
# ---------------------------------------------------------------------------
def _ref_forward(token_ids, attn_mask, params, compute_dtype=jnp.bfloat16):
    cls_vec = backbone_cls_stub(token_ids, attn_mask, params["emb"])
    h = jnp.dot(cls_vec.astype(compute_dtype),
                params["w1"].astype(compute_dtype),
                preferred_element_type=jnp.float32) + params["b1"]
    h = 0.5 * h * (1.0 + jax.lax.erf(h * _SQRT_HALF))
    return jnp.dot(h, params["w2"].astype(jnp.float32),
                   preferred_element_type=jnp.float32) + params["b2"]


if __name__ == "__main__":
    # Small shapes consistent with the module's forward:
    #   x          : (B, S)  int32 token ids
    #   attn_mask  : (B, S)  int32 {0,1}
    #   backbone   -> hidden size bert_output_size (scaled down from 1024)
    B, S = 200, 8            # B chosen to exercise the batch grid + padding
    BERT_OUT = 256           # bert_output_size
    HIDDEN = 16              # hidden_size
    NUM_CLASSES = 1
    VOCAB = 64

    key = jax.random.PRNGKey(0)
    k_emb, k_w1, k_b1, k_w2, k_b2, k_tok = jax.random.split(key, 6)

    params = {
        "emb": jax.random.normal(k_emb, (VOCAB, BERT_OUT), jnp.float32) * 0.02,
        "w1": jax.random.normal(k_w1, (BERT_OUT, HIDDEN), jnp.float32) * 0.02,
        "b1": jax.random.normal(k_b1, (HIDDEN,), jnp.float32) * 0.02,
        "w2": jax.random.normal(k_w2, (HIDDEN, NUM_CLASSES), jnp.float32) * 0.02,
        "b2": jax.random.normal(k_b2, (NUM_CLASSES,), jnp.float32) * 0.02,
    }

    token_ids = jax.random.randint(k_tok, (B, S), 0, VOCAB, dtype=jnp.int32)
    attn_mask = jnp.ones((B, S), dtype=jnp.int32)

    out = jax.block_until_ready(bert_model_forward(token_ids, attn_mask, params))
    ref = jax.block_until_ready(_ref_forward(token_ids, attn_mask, params))

    assert out.shape == (B, NUM_CLASSES), out.shape
    assert jnp.allclose(out, ref, atol=2e-5, rtol=1e-4), (
        float(jnp.max(jnp.abs(out - ref))))
    print("KERNEL_OK")
</pallas_src>

<mosaic_0001>
module attributes {stable_mosaic.version = 11 : i64} {
  func.func @_bert_head_kernel(%arg0: i32, %arg1: memref<128x256xbf16, #tpu.memory_space<vmem>>, %arg2: memref<256x128xbf16, #tpu.memory_space<vmem>>, %arg3: memref<1x128xf32, #tpu.memory_space<vmem>>, %arg4: memref<1x128xf32, #tpu.memory_space<vmem>>, %arg5: memref<1x1xf32, #tpu.memory_space<vmem>>, %arg6: memref<128x1xf32, #tpu.memory_space<vmem>>) attributes {dimension_semantics = [#tpu.dimension_semantics<parallel>], iteration_bounds = array<i64: 2>, scalar_prefetch = 0 : i64, scratch_operands = 0 : i64, tpu.core_type = #tpu.core_type<tc>, window_params = [{transform_indices = @transform_0, window_bounds = array<i64: 128, 256>}, {pipeline_mode = #tpu.pipeline_mode<synchronous>, transform_indices = @transform_1, window_bounds = array<i64: 256, 128>}, {pipeline_mode = #tpu.pipeline_mode<synchronous>, transform_indices = @transform_2, window_bounds = array<i64: 1, 128>}, {pipeline_mode = #tpu.pipeline_mode<synchronous>, transform_indices = @transform_3, window_bounds = array<i64: 1, 128>}, {pipeline_mode = #tpu.pipeline_mode<synchronous>, transform_indices = @transform_4, window_bounds = array<i64: 1, 1>}, {transform_indices = @transform_5, window_bounds = array<i64: 128, 1>}]} {
    %c0 = arith.constant 0 : index
    %c0_0 = arith.constant 0 : index
    %0 = vector.load %arg1[%c0, %c0_0] : memref<128x256xbf16, #tpu.memory_space<vmem>>, vector<128x256xbf16>
    %c0_1 = arith.constant 0 : index
    %c0_2 = arith.constant 0 : index
    %1 = vector.load %arg2[%c0_1, %c0_2] : memref<256x128xbf16, #tpu.memory_space<vmem>>, vector<256x128xbf16>
    %cst = arith.constant dense<0.000000e+00> : vector<128x128xf32>
    %2 = tpu.matmul %0, %1, %cst {dimension_numbers = #tpu.dot_dimension_numbers<[1], [0], [0], [1], [0, 0, 1, 1], [], []>} : vector<128x256xbf16>, vector<256x128xbf16>, vector<128x128xf32> -> vector<128x128xf32>
    %c0_3 = arith.constant 0 : index
    %c0_4 = arith.constant 0 : index
    %3 = vector.load %arg3[%c0_3, %c0_4] : memref<1x128xf32, #tpu.memory_space<vmem>>, vector<1x128xf32>
    %4 = vector.broadcast %3 : vector<1x128xf32> to vector<128x128xf32>
    %5 = arith.addf %2, %4 : vector<128x128xf32>
    %cst_5 = arith.constant 5.000000e-01 : f32
    %6 = vector.broadcast %cst_5 : f32 to vector<128x128xf32>
    %7 = arith.mulf %6, %5 : vector<128x128xf32>
    %cst_6 = arith.constant 0.707106769 : f32
    %8 = vector.broadcast %cst_6 : f32 to vector<128x128xf32>
    %9 = arith.mulf %5, %8 : vector<128x128xf32>
    %10 = math.erf %9 : vector<128x128xf32>
    %cst_7 = arith.constant 1.000000e+00 : f32
    %11 = vector.broadcast %cst_7 : f32 to vector<128x128xf32>
    %12 = arith.addf %11, %10 : vector<128x128xf32>
    %13 = arith.mulf %7, %12 : vector<128x128xf32>
    %c0_8 = arith.constant 0 : index
    %c0_9 = arith.constant 0 : index
    %14 = vector.load %arg4[%c0_8, %c0_9] : memref<1x128xf32, #tpu.memory_space<vmem>>, vector<1x128xf32>
    %15 = vector.broadcast %14 : vector<1x128xf32> to vector<128x128xf32>
    %16 = arith.mulf %13, %15 : vector<128x128xf32>
    %cst_10 = arith.constant dense<0.000000e+00> : vector<128xf32>
    %17 = vector.multi_reduction <add>, %16, %cst_10 [1] : vector<128x128xf32> to vector<128xf32>
    %18 = vector.shape_cast %17 : vector<128xf32> to vector<128x1xf32>
    %c0_11 = arith.constant 0 : index
    %c0_12 = arith.constant 0 : index
    %19 = vector.load %arg5[%c0_11, %c0_12] : memref<1x1xf32, #tpu.memory_space<vmem>>, vector<1x1xf32>
    %20 = vector.broadcast %19 : vector<1x1xf32> to vector<128x1xf32>
    %21 = arith.addf %18, %20 : vector<128x1xf32>
    %c0_13 = arith.constant 0 : index
    %c0_14 = arith.constant 0 : index
    %22 = vector.load %arg6[%c0_13, %c0_14] : memref<128x1xf32, #tpu.memory_space<vmem>>, vector<128x1xf32>
    tpu.vector_store %arg6[%c0_13, %c0_14], %21 {strides = array<i32>} : memref<128x1xf32, #tpu.memory_space<vmem>>, vector<128x1xf32>,
    return
  }
  func.func @transform_0(%arg0: i32) -> (i32, i32) {
    %c0_i32 = arith.constant 0 : i32
    %c0_i32_0 = arith.constant 0 : i32
    return %arg0, %c0_i32 : i32, i32
  }
  func.func @transform_1(%arg0: i32) -> (i32, i32) {
    %c0_i32 = arith.constant 0 : i32
    %c0_i32_0 = arith.constant 0 : i32
    %c0_i32_1 = arith.constant 0 : i32
    return %c0_i32, %c0_i32_0 : i32, i32
  }
  func.func @transform_2(%arg0: i32) -> (i32, i32) {
    %c0_i32 = arith.constant 0 : i32
    %c0_i32_0 = arith.constant 0 : i32
    %c0_i32_1 = arith.constant 0 : i32
    return %c0_i32, %c0_i32_0 : i32, i32
  }
  func.func @transform_3(%arg0: i32) -> (i32, i32) {
    %c0_i32 = arith.constant 0 : i32
    %c0_i32_0 = arith.constant 0 : i32
    %c0_i32_1 = arith.constant 0 : i32
    return %c0_i32, %c0_i32_0 : i32, i32
  }
  func.func @transform_4(%arg0: i32) -> (i32, i32) {
    %c0_i32 = arith.constant 0 : i32
    %c0_i32_0 = arith.constant 0 : i32
    %c0_i32_1 = arith.constant 0 : i32
    return %c0_i32, %c0_i32_0 : i32, i32
  }
  func.func @transform_5(%arg0: i32) -> (i32, i32) {
    %c0_i32 = arith.constant 0 : i32
    %c0_i32_0 = arith.constant 0 : i32
    return %arg0, %c0_i32 : i32, i32
  }
}

</mosaic_0001>

<bundles_post_ra>
// kernel: tpu_custom_call.1
= control target key start
LH: loop header
LB: loop body
LE: loop exit
PB: predicated region body
PF: predicated region fallthrough
CT: control target
= control target key end

     0   :  { %s1521_s0 = inlined_call_operand.hbm [shape: bf16[256,256], index: 0, kind: input, shape index: {}]   ;;  %s1522_s1 = inlined_call_operand.hbm [shape: bf16[256,128], index: 1, kind: input, shape index: {}]   ;;  %s1523_s2 = inlined_call_operand.vmem [shape: f32[1,128], index: 2, kind: input, shape index: {}]   ;;  %s1524_s3 = inlined_call_operand.vmem [shape: f32[1,128], index: 3, kind: input, shape index: {}]   ;;  %s1525_s4 = inlined_call_operand.<no memory space> [shape: f32[1,1], index: 4, kind: input, shape index: {}]   ;;  %s1526_s5 = inlined_call_operand.vmem [shape: f32[256,1], index: 5, kind: output, shape index: {}]  }
   0x1   :  { %v10_v0 = vstv %s1525_s4 }
   0x2   :  { %11 = vst [vmem:[#allocation2] sm:$0x1] %v10_v0 }
   0x3   :  { %12 = vsyncpa [#allocation4], 0 }
   0x4   :  { %14 = vsyncpa [#allocation4 + $0x1], 0 }
   0x5   :  { %15 = vsyncpa [#allocation6], 0  ;;  %s1242_s20 = smov 0   ;;  %s1244_s21 = smov 0  }
   0x6   :  { %s1246_s22 = smov 0   ;;  %s1248_s23 = smov 0  }
   0x7 LB: > { %s846_s4 = sadd.s32 4294967295, %s1201_s23   ;;  %p41_p0 = scmp.ne.s32.totalorder %s1193_s21, %s1189_s20  ;;  %s1201_s23 = sphi %s1248_s23, %s1543_s23   ;;  %s1197_s22 = sphi %s1246_s22, %s1542_s22   ;;  %s1193_s21 = sphi %s1244_s21, %s1541_s21   ;;  %s1189_s20 = sphi %s1242_s20, %s1540_s20  }
   0x8   : > { %p1264_p1 = scmp.eq.s32.totalorder %s846_s4, 0  ;;  %p848_p2 = scmp.ge.s32.totalorder %s1201_s23, 1 }
   0x9   : > { %p162_p3 = scmp.lt.s32.totalorder %s1201_s23, 3  ;;  %s1203_s27 = smov [#allocation5]  }
   0xa   : > { %s1531_s24 = scalar_select %p1264_p1, 1, 0 }
   0xb   : > { %p1272_p4 = por %p1264_p1, %p41_p0  ;;  %p1276_p5 = pnand %p848_p2, %p162_p3 }
   0xc   : > { %s174_s28 = sshll.u32 %s1203_s27, 4  ;;  %s1289_s30 = sadd.s32 1, %s1201_s23   ;;  %s175_s28 = int_to_ptr.vmem [resolvable:$true] %s174_s28 }
   0xd   : > { %s1532_s25 = scalar_select %p1272_p4, 1, 0 }
   0xe   : > { %s1533_s26 = scalar_select %p1276_p5, 1, 0 }
   0xf   : > { %p985_p6 = pneg %p1276_p5  ;;  %s28_s6 = sadd.s32 1, %s1197_s22 }
  0x10   : > { %s25_s7 = ssub.s32 %s1201_s23, %s1289_s30  ;;  %s1105_s10 = scalar_lea.hbm %s1522_s1, 2048 }
  0x11   : > { %p1284_p7 = pnand %p985_p6, %p1264_p1  ;;  %p1106_p8 = scmp.ne.s32.totalorder %s1522_s1, %s1105_s10 }
  0x12   : > { %p1112_p12 = scmp.lt.u32.totalorder %s1105_s10, %s1522_s1 }
  0x13   : > { %p1107_p9 = pneg %p1284_p7 }
  0x15   : > { %p1108_p10 = pnand %p1107_p9, %p1106_p8 }
  0x17   : > { %p1109_p11 = pneg %p1108_p10 }
  0x19   : > { %p1114_p13 = pnand %p1112_p12, %p1109_p11 }
  0x1b   : > { %1117 = shalt.err (!%p1114_p13)
}
  0x1c   : > { %s1118_s15 = scalar_lea.vmem %s175_s28, 2048  ;;  %p1126_p6 = scmp.lt.s32.totalorder %s175_s28, %s175_s28 }
  0x1d   : > { %p1119_p0 = scmp.ne.s32.totalorder %s175_s28, %s1118_s15  ;;  %p1127_p1 = scmp.lt.s32.totalorder %s1118_s15, %s1118_s15 }
  0x1f   : > { %p1121_p2 = pnand %p1119_p0, %p1107_p9  ;;  %p1128_p4 = por %p1127_p1, %p1126_p6 }
  0x21   : > { %p1122_p3 = pneg %p1121_p2 }
  0x23   : > { %p1129_p5 = pnand %p1128_p4, %p1122_p3 }
  0x25   : > { %1132 = shalt.err (!%p1129_p5)
}
  0x26   : > { %s1204_s16 = smov 64   ;;  %s1205_s17 = smov 4  }
  0x27   : > { %988 = dma.hbm_to_vmem [thread:$0]  (!%p1284_p7), %s1522_s1, 2048, %s175_s28, [#allocation6], %s1204_s16, %s1204_s16, %s1205_s17  }
  0x28   : > { %p26_p8 = scmp.eq.s32.totalorder %s25_s7, 0  ;;  %p35_p9 = scmp.ne.s32.totalorder %s1197_s22, %s1193_s21 }
  0x29   : > { %p36_p1 = scmp.eq.s32.totalorder %s1201_s23, 0  ;;  %p994_p4 = scmp.lt.s32.totalorder %s1201_s23, 2 }
  0x2a   : > { %s1315_s20 = scalar_select %p26_p8, %s1197_s22, %s28_s6  }
  0x2b   : > { %p37_p5 = por %p36_p1, %p35_p9  ;;  %s197_s27 = sand.u32 1, %s1197_s22  }
  0x2c   : > { %s851_s8 = sshll.u32 %s197_s27, 7  ;;  %s898_s9 = sshll.u32 %s1201_s23, 11 }
  0x2d   : > { %s1322_s12 = scalar_lea.hbm %s1521_s0, %s898_s9  ;;  %s201_s28 = scalar_lea.vmem [#allocation3], %s851_s8 }
  0x2e   : > { %s209_s29 = sshll.u32 %s201_s28, 4  ;;  %p1326_p7 = pnand %p994_p4, %p37_p5  ;;  %s1324_s29 = int_to_ptr.vmem [resolvable:$true] %s209_s29 }
  0x2f   : > { %s1330_s7 = scalar_lea.sflag [#allocation4], %s197_s27  ;;  %s1133_s13 = scalar_lea.hbm %s1322_s12, 2048 }
  0x30   : > { %p1134_p10 = scmp.ne.s32.totalorder %s1322_s12, %s1133_s13  ;;  %p1135_p11 = pneg %p1326_p7 }
  0x31   : > { %s1138_s16 = scalar_lea.hbm %s1521_s0, 4096  ;;  %p1139_p0 = scmp.lt.u32.totalorder %s1322_s12, %s1521_s0 }
  0x32   : > { %p1136_p12 = pnand %p1135_p11, %p1134_p10  ;;  %p1140_p2 = scmp.lt.u32.totalorder %s1138_s16, %s1133_s13 }
  0x33   : > { %p1142_p6 = scmp.lt.u32.totalorder %s1133_s13, %s1322_s12 }
  0x34   : > { %p1137_p13 = pneg %p1136_p12  ;;  %p1141_p3 = por %p1140_p2, %p1139_p0 }
  0x36   : > { %p1143_p8 = por %p1142_p6, %p1141_p3 }
  0x38   : > { %p1144_p9 = pnand %p1143_p8, %p1137_p13 }
  0x3a   : > { %1147 = shalt.err (!%p1144_p9)
}
  0x3b   : > { %s1148_s19 = scalar_lea.vmem %s1324_s29, 2048  ;;  %s1206_s27 = smov [#allocation3]  }
  0x3c   : > { %p1149_p1 = scmp.ne.s32.totalorder %s1324_s29, %s1148_s19  ;;  %s1153_s8 = sshll.u32 %s1206_s27, 4  ;;  %s1154_s8 = int_to_ptr.vmem [resolvable:$false] %s1153_s8 }
  0x3d   : > { %s1155_s9 = scalar_lea.vmem %s1154_s8, 4096  ;;  %p1156_p10 = scmp.lt.s32.totalorder %s1324_s29, %s1154_s8 }
  0x3e   : > { %p1151_p4 = pnand %p1149_p1, %p1135_p11  ;;  %p1157_p12 = scmp.lt.s32.totalorder %s1155_s9, %s1148_s19 }
  0x40   : > { %p1152_p5 = pneg %p1151_p4  ;;  %p1158_p0 = por %p1157_p12, %p1156_p10 }
  0x42   : > { %p1159_p2 = pnand %p1158_p0, %p1152_p5 }
  0x44   : > { %1162 = shalt.err (!%p1159_p2)
}
  0x45   : > { %s1207_s10 = smov 128   ;;  %s1208_s11 = smov 8  }
  0x46   : > { %992 = dma.hbm_to_vmem [thread:$0]  (!%p1326_p7), %s1322_s12, 2048, %s1324_s29, %s1330_s7, %s1207_s10, %s1207_s10, %s1208_s11  }
  0x47   : > { %p1536_p11 = scmp.ne.s32.totalorder %s1533_s26, 0 }
  0x48   : > { %s223_s28 = sand.u32 (!%p1536_p11), 1, %s1193_s21   ;;  %p1537_p13 = scmp.ne.s32.totalorder (!%p1536_p11), %s1532_s25, 0 }
  0x49   : > { %221 = sbr.rel (%p1536_p11) target bundleno = 530 (0x212), region = 40  ;;  %s856_s13 = sshll.u32 (!%p1536_p11), %s223_s28, 7 }
  0x4a   : > { %s224_s14 = scalar_lea.sflag (!%p1536_p11), [#allocation4], %s223_s28  ;;  %s1361_s15 = scalar_lea.vmem (!%p1536_p11), [#allocation3], %s856_s13 }
  0x50   : > { %1180 = dma.done.wait (%p1537_p13), %s224_s14, 2048  }
  0x51   : > { %1182 = vsyncadd (%p1537_p13), %s224_s14, 4294965248  ;;  %p1538_p3 = scmp.ne.s32.totalorder %s1531_s24, 0 }
  0x53   : > { %1184 = dma.done.wait (%p1538_p3), [#allocation6], 2048  }
  0x54   : > { %1186 = vsyncadd (%p1538_p3), [#allocation6], 4294965248  ;;  %v1033_v1 = vld [vmem:[#allocation5 + $0x40] sm:$0xff]   ;;  %v1035_v3 = vld [vmem:[#allocation5 + $0x48] sm:$0xff]   ;;  %s858_s29 = sshll.u32 %s846_s4, 4  ;;  %vm752_vm0 = vcmask 7168  }
  0x55   : > { %v1034_v2 = vld [vmem:[#allocation5] sm:$0xff]   ;;  %899 = vmatprep.subr.bf16.mxu0 %v1033_v1  ;;  %963 = vmatprep.subr.bf16.mxu1 %v1033_v1  ;;  %v1036_v4 = vld [vmem:[#allocation5 + $0x8] sm:$0xff]   ;;  %v1037_v5 = vld [vmem:[#allocation5 + $0x50] sm:$0xff]   ;;  %p260_p7 = scmp.lt.s32.totalorder %s858_s29, 31 }
  0x56   : > { %900 = vmatpush3.bf16.msra.mxu0 %v1034_v2  ;;  %971 = vmatpush3.bf16.msra.mxu1 %v1034_v2  ;;  %v1038_v6 = vld [vmem:[#allocation5 + $0x10] sm:$0xff]   ;;  %v1039_v7 = vld [vmem:[#allocation5 + $0x58] sm:$0xff]   ;;  %v1041_v9 = vld [vmem:[#allocation5 + $0x60] sm:$0xff]  }
  0x57   : > { %901 = vmatprep.subr.bf16.mxu0 %v1035_v3  ;;  %964 = vmatprep.subr.bf16.mxu1 %v1035_v3  ;;  %v1040_v8 = vld [vmem:[#allocation5 + $0x18] sm:$0xff]   ;;  %v1042_v10 = vld [vmem:[#allocation5 + $0x20] sm:$0xff]   ;;  %v1043_v11 = vld [vmem:[#allocation5 + $0x68] sm:$0xff]   ;;  %s1545_s29 = smov (!%p260_p7, %s858_s29), 31 }
  0x58   : > { %v1051_v12 = vld [vmem:[%s1361_s15 + $0x4] ss:$8 sps:$4 sm:$0xff]   ;;  %v1045_v15 = vld [vmem:[#allocation5 + $0x70] sm:$0xff]   ;;  %v1047_v17 = vld [vmem:[#allocation5 + $0x78] sm:$0xff]   ;;  %s859_s6 = sshll.u32 %s1545_s29, 3 }
  0x59   : > { %v1054_v13 = vld [vmem:[%s1361_s15 + $0x44] ss:$8 sps:$4 sm:$0xff]   ;;  %529 = vmatprep.mubr.bf16.mxu0 %v1051_v12  ;;  %v1046_v16 = vld [vmem:[#allocation5 + $0x30] sm:$0xff]   ;;  %v1048_v18 = vld [vmem:[#allocation5 + $0x38] sm:$0xff]   ;;  %s1474_s17 = scalar_lea.vmem %s1526_s5, %s859_s6 }
  0x5a   : > { %902 = vmatpush3.bf16.msra.mxu0 %v1036_v4  ;;  %972 = vmatpush3.bf16.msra.mxu1 %v1036_v4  ;;  %v1044_v14 = vld [vmem:[#allocation5 + $0x28] sm:$0xff]   ;;  %v1055_v21 = vld [vmem:[%s1361_s15 + $0x14] ss:$8 sps:$4 sm:$0xff]   ;;  %v1059_v23 = vld [vmem:[%s1361_s15 + $0x10] ss:$8 sps:$4 sm:$0xff]  }
  0x5b   : > { %903 = vmatprep.subr.bf16.mxu0 %v1037_v5  ;;  %965 = vmatprep.subr.bf16.mxu1 %v1037_v5  ;;  %v1049_v19 = vld [vmem:[%s1361_s15] ss:$8 sps:$4 sm:$0xff]   ;;  %v1057_v22 = vld [vmem:[%s1361_s15 + $0x54] ss:$8 sps:$4 sm:$0xff]   ;;  %v1060_v24 = vld [vmem:[%s1361_s15 + $0x50] ss:$8 sps:$4 sm:$0xff]  }
  0x5c   : > { %561 = vmatprep.mubr.bf16.mxu1 %v1054_v13  ;;  %v1052_v20 = vld [vmem:[%s1361_s15 + $0x40] ss:$8 sps:$4 sm:$0xff]   ;;  %v1061_v25 = vld [vmem:[%s1361_s15 + $0x24] ss:$8 sps:$4 sm:$0xff]   ;;  %v1067_v29 = vld [vmem:[%s1361_s15 + $0x34] ss:$8 sps:$4 sm:$0xff]  }
  0x5d   : > { %v1063_v26 = vld [vmem:[%s1361_s15 + $0x64] ss:$8 sps:$4 sm:$0xff]   ;;  %v1065_v27 = vld [vmem:[%s1361_s15 + $0x20] ss:$8 sps:$4 sm:$0xff]   ;;  %v1069_v30 = vld [vmem:[%s1361_s15 + $0x74] ss:$8 sps:$4 sm:$0xff]  }
  0x5e   : > { %904 = vmatpush3.bf16.msra.mxu0 %v1038_v6  ;;  %973 = vmatpush3.bf16.msra.mxu1 %v1038_v6  ;;  %v1066_v28 = vld [vmem:[%s1361_s15 + $0x60] ss:$8 sps:$4 sm:$0xff]   ;;  %v1071_v31 = vld [vmem:[%s1361_s15 + $0x30] ss:$8 sps:$4 sm:$0xff]   ;;  %v1390_v35 = vld [vmem:[%s1523_s2] ss:$0 sm:$0xff] }
  0x5f   : > { %905 = vmatprep.subr.bf16.mxu0 %v1039_v7  ;;  %966 = vmatprep.subr.bf16.mxu1 %v1039_v7  ;;  %v1072_v32 = vld [vmem:[%s1361_s15 + $0x70] ss:$8 sps:$4 sm:$0xff]  }
  0x62   : > { %906 = vmatpush3.bf16.msra.mxu0 %v1040_v8  ;;  %974 = vmatpush3.bf16.msra.mxu1 %v1040_v8 }
  0x63   : > { %907 = vmatprep.subr.bf16.mxu0 %v1041_v9  ;;  %967 = vmatprep.subr.bf16.mxu1 %v1041_v9 }
  0x66   : > { %908 = vmatpush3.bf16.msra.mxu0 %v1042_v10  ;;  %975 = vmatpush3.bf16.msra.mxu1 %v1042_v10 }
  0x67   : > { %909 = vmatprep.subr.bf16.mxu0 %v1043_v11  ;;  %968 = vmatprep.subr.bf16.mxu1 %v1043_v11 }
  0x6a   : > { %910 = vmatpush3.bf16.msra.mxu0 %v1044_v14  ;;  %976 = vmatpush3.bf16.msra.mxu1 %v1044_v14 }
  0x6b   : > { %911 = vmatprep.subr.bf16.mxu0 %v1045_v15  ;;  %969 = vmatprep.subr.bf16.mxu1 %v1045_v15 }
  0x6e   : > { %912 = vmatpush3.bf16.msra.mxu0 %v1046_v16  ;;  %977 = vmatpush3.bf16.msra.mxu1 %v1046_v16 }
  0x6f   : > { %913 = vmatprep.subr.bf16.mxu0 %v1047_v17  ;;  %970 = vmatprep.subr.bf16.mxu1 %v1047_v17 }
  0x72   : > { %914 = vmatpush3.bf16.msra.mxu0 %v1048_v18  ;;  %978 = vmatpush3.bf16.msra.mxu1 %v1048_v18 }
  0x75   : > { %530 = vmatmul.mubr.bf16.vlgmr.msra.gmra.mrb[0].mxu0 %v1049_v19  ;;  %562 = vmatmul.mubr.bf16.vlgmr.msra.gmra.mrb[0].mxu1 %v1052_v20 }
  0x76   : > { %537 = vmatprep.mubr.bf16.mxu0 %v1055_v21  ;;  %569 = vmatprep.mubr.bf16.mxu1 %v1057_v22 }
  0x7d   : > { %538 = vmatmul.mubr.bf16.gmra.mrb[4].mxu0 %v1059_v23  ;;  %570 = vmatmul.mubr.bf16.gmra.mrb[4].mxu1 %v1060_v24 }
  0x7e   : > { %545 = vmatprep.mubr.bf16.mxu0 %v1061_v25  ;;  %577 = vmatprep.mubr.bf16.mxu1 %v1063_v26 }
  0x85   : > { %546 = vmatmul.mubr.bf16.gmra.mrb[8].mxu0 %v1065_v27  ;;  %578 = vmatmul.mubr.bf16.gmra.mrb[8].mxu1 %v1066_v28  ;;  %v1424_v28 = vld [vmem:[%s1524_s3] ss:$0 sm:$0xff] }
  0x86   : > { %553 = vmatprep.mubr.bf16.mxu0 %v1067_v29  ;;  %585 = vmatprep.mubr.bf16.mxu1 %v1069_v30 }
  0x8d   : > { %554 = vmatmul.mubr.bf16.gmra.mrb[12].mxu0 %v1071_v31  ;;  %586 = vmatmul.mubr.bf16.gmra.mrb[12].mxu1 %v1072_v32 }
 0x148   : > { %v915_v33 = vpop.f32.mrb[0].mxu0  ;;  %v939_v34 = vpop.f32.mrb[0].mxu1 }
 0x149   : > { %v916_v36 = vpop.f32.mrb[1].mxu0  ;;  %v940_v37 = vpop.f32.mrb[1].mxu1 }
 0x14a   : > { %v917_v38 = vadd.f32 %v916_v36, %v915_v33  ;;  %v941_v39 = vadd.f32 %v940_v37, %v939_v34  ;;  %v918_v40 = vpop.f32.mrb[2].mxu0  ;;  %v942_v41 = vpop.f32.mrb[2].mxu1 }
 0x14b   : > { %v919_v42 = vpop.f32.mrb[3].mxu0  ;;  %v943_v43 = vpop.f32.mrb[3].mxu1 }
 0x14c   : > { %v532_v44 = vadd.f32 %v917_v38, %v1390_v35  ;;  %v564_v45 = vadd.f32 %v941_v39, %v1390_v35  ;;  %v920_v46 = vadd.f32 %v919_v42, %v918_v40  ;;  %v944_v47 = vadd.f32 %v943_v43, %v942_v41 }
 0x14e   : > { %v610_v48 = vmul.f32 0.70710677, %v532_v44  ;;  %v618_v49 = vmul.f32 0.70710677, %v564_v45  ;;  %v535_v50 = vadd.f32 %v920_v46, %v1390_v35  ;;  %v1396_v51 = vadd.f32 %v944_v47, %v1390_v35 }
 0x14f   : > { %v594_v22 = vmul.f32 0.5, %v532_v44  ;;  %v602_v34 = vmul.f32 0.5, %v564_v45 }
 0x150   : > { %1073 = verf.f32 %v610_v48  ;;  %v611_v52 = vmul.f32 0.70710677, %v535_v50  ;;  %v921_v53 = vpop.f32.mrb[4].mxu0  ;;  %v945_v54 = vpop.f32.mrb[4].mxu1  ;;  %v619_v55 = vmul.f32 0.70710677, %v1396_v51 }
 0x151   : > { %1075 = verf.f32 %v618_v49  ;;  %v922_v56 = vpop.f32.mrb[5].mxu0  ;;  %v946_v57 = vpop.f32.mrb[5].mxu1  ;;  %v595_v36 = vmul.f32 0.5, %v535_v50  ;;  %v603_v46 = vmul.f32 0.5, %v1396_v51 }
 0x152   : > { %1077 = verf.f32 %v611_v52  ;;  %v923_v58 = vadd.f32 %v922_v56, %v921_v53  ;;  %v947_v59 = vadd.f32 %v946_v57, %v945_v54  ;;  %v924_v60 = vpop.f32.mrb[6].mxu0  ;;  %v948_v61 = vpop.f32.mrb[6].mxu1 }
 0x153   : > { %1079 = verf.f32 %v619_v55  ;;  %v925_v62 = vpop.f32.mrb[7].mxu0  ;;  %v949_v63 = vpop.f32.mrb[7].mxu1 }
 0x154   : > { %v1400_v0 = vadd.f32 %v923_v58, %v1390_v35  ;;  %v1403_v1 = vadd.f32 %v947_v59, %v1390_v35  ;;  %v926_v2 = vadd.f32 %v925_v62, %v924_v60  ;;  %v950_v3 = vadd.f32 %v949_v63, %v948_v61 }
 0x156   : > { %v612_v4 = vmul.f32 0.70710677, %v1400_v0  ;;  %v620_v5 = vmul.f32 0.70710677, %v1403_v1  ;;  %v1408_v6 = vadd.f32 %v926_v2, %v1390_v35  ;;  %v1411_v7 = vadd.f32 %v950_v3, %v1390_v35 }
 0x157   : > { %v596_v60 = vmul.f32 0.5, %v1400_v0 }
 0x158   : > { %1081 = verf.f32 %v612_v4  ;;  %v927_v8 = vpop.f32.mrb[8].mxu0  ;;  %v951_v9 = vpop.f32.mrb[8].mxu1  ;;  %v613_v10 = vmul.f32 0.70710677, %v1408_v6  ;;  %v621_v14 = vmul.f32 0.70710677, %v1411_v7 }
 0x159   : > { %1083 = verf.f32 %v620_v5  ;;  %v928_v11 = vpop.f32.mrb[9].mxu0  ;;  %v952_v12 = vpop.f32.mrb[9].mxu1 }
 0x15a   : > { %v1074_v13 = vpop.eup %1073  ;;  %v929_v15 = vadd.f32 %v928_v11, %v927_v8  ;;  %v953_v16 = vadd.f32 %v952_v12, %v951_v9  ;;  %v930_v17 = vpop.f32.mrb[10].mxu0  ;;  %1085 = verf.f32 %v613_v10  ;;  %v604_v12 = vmul.f32 0.5, %v1403_v1 }
 0x15b   : > { %v954_v18 = vpop.f32.mrb[10].mxu1  ;;  %v1076_v19 = vpop.eup %1075  ;;  %v642_v23 = vadd.f32 1.0, %v1074_v13  ;;  %1087 = verf.f32 %v621_v14 }
 0x15c   : > { %v931_v20 = vpop.f32.mrb[11].mxu0  ;;  %v955_v21 = vpop.f32.mrb[11].mxu1  ;;  %v1416_v25 = vadd.f32 %v929_v15, %v1390_v35  ;;  %v1419_v26 = vadd.f32 %v953_v16, %v1390_v35  ;;  %v650_v32 = vadd.f32 1.0, %v1076_v19 }
 0x15d   : > { %v1078_v24 = vpop.eup %1077  ;;  %v932_v27 = vadd.f32 %v931_v20, %v930_v17  ;;  %v956_v30 = vadd.f32 %v955_v21, %v954_v18  ;;  %v658_v31 = vmul.f32 %v642_v23, %v594_v22  ;;  %v597_v20 = vmul.f32 0.5, %v1408_v6 }
 0x15e   : > { %v1080_v29 = vpop.eup %1079  ;;  %v643_v33 = vadd.f32 1.0, %v1078_v24  ;;  %v614_v37 = vmul.f32 0.70710677, %v1416_v25  ;;  %v622_v38 = vmul.f32 0.70710677, %v1419_v26  ;;  %v666_v45 = vmul.f32 %v650_v32, %v602_v34 }
 0x15f   : > { %v1429_v39 = vadd.f32 %v932_v27, %v1390_v35  ;;  %v1432_v40 = vadd.f32 %v956_v30, %v1390_v35  ;;  %v681_v41 = vmul.f32 %v1424_v28, %v658_v31  ;;  %v651_v42 = vadd.f32 1.0, %v1080_v29 }
 0x160   : > { %1089 = verf.f32 %v614_v37  ;;  %v933_v43 = vpop.f32.mrb[12].mxu0  ;;  %v957_v44 = vpop.f32.mrb[12].mxu1  ;;  %v659_v50 = vmul.f32 %v643_v33, %v595_v36  ;;  %v689_v62 = vmul.f32 %v1424_v28, %v666_v45  ;;  %v605_v24 = vmul.f32 0.5, %v1411_v7 }
 0x161   : > { %1091 = verf.f32 %v622_v38  ;;  %v615_v47 = vmul.f32 0.70710677, %v1429_v39  ;;  %v934_v48 = vpop.f32.mrb[13].mxu0  ;;  %v958_v49 = vpop.f32.mrb[13].mxu1  ;;  %697 = vadd.xlane.f32.xlu0 %v681_v41  ;;  %v623_v53 = vmul.f32 0.70710677, %v1432_v40  ;;  %v667_v58 = vmul.f32 %v651_v42, %v603_v46 }
 0x162   : > { %v1082_v52 = vpop.eup %1081  ;;  %v935_v54 = vadd.f32 %v934_v48, %v933_v43  ;;  %v959_v55 = vadd.f32 %v958_v49, %v957_v44  ;;  %v936_v56 = vpop.f32.mrb[14].mxu0  ;;  %v682_v15 = vmul.f32 %v1424_v28, %v659_v50  ;;  %v606_v34 = vmul.f32 0.5, %v1419_v26 }
 0x163   : > { %v960_v57 = vpop.f32.mrb[14].mxu1  ;;  %v1084_v59 = vpop.eup %1083  ;;  %1093 = verf.f32 %v615_v47  ;;  %v644_v63 = vadd.f32 1.0, %v1082_v52  ;;  %v690_v8 = vmul.f32 %v1424_v28, %v667_v58  ;;  %v599_v42 = vmul.f32 0.5, %v1429_v39 }
 0x164   : > { %v961_v51 = vpop.f32.mrb[15].mxu1  ;;  %v937_v61 = vpop.f32.mrb[15].mxu0  ;;  %1095 = verf.f32 %v623_v53  ;;  %v556_v2 = vadd.f32 %v935_v54, %v1390_v35  ;;  %v588_v3 = vadd.f32 %v959_v55, %v1390_v35  ;;  %v652_v11 = vadd.f32 1.0, %v1084_v59 }
 0x165   : > { %v962_v4 = vadd.f32 %v961_v51, %v960_v57  ;;  %v1086_v5 = vpop.eup %1085  ;;  %v938_v9 = vadd.f32 %v937_v61, %v936_v56  ;;  %713 = vadd.xlane.f32.xlu0 %v689_v62  ;;  %v660_v10 = vmul.f32 %v644_v63, %v596_v60  ;;  %715 = vadd.xlane.f32.xlu1 %v690_v8  ;;  %v607_v48 = vmul.f32 0.5, %v1432_v40 }
 0x166   : > { %v1088_v0 = vpop.eup %1087  ;;  %v616_v13 = vmul.f32 0.70710677, %v556_v2  ;;  %v624_v14 = vmul.f32 0.70710677, %v588_v3  ;;  %v645_v19 = vadd.f32 1.0, %v1086_v5  ;;  %v668_v21 = vmul.f32 %v652_v11, %v604_v12 }
 0x167   : > { %v1446_v16 = vadd.f32 %v962_v4, %v1390_v35  ;;  %v559_v17 = vadd.f32 %v938_v9, %v1390_v35  ;;  %v683_v18 = vmul.f32 %v1424_v28, %v660_v10  ;;  %v653_v22 = vadd.f32 1.0, %v1088_v0  ;;  %v894_v9 = vld [vmem:[#allocation2] ss:$0 sm:$0xff] }
 0x168   : > { %1097 = verf.f32 %v616_v13  ;;  %v661_v29 = vmul.f32 %v645_v19, %v597_v20  ;;  %v598_v35 = vmul.f32 0.5, %v1416_v25  ;;  %v691_v31 = vmul.f32 %v1424_v28, %v668_v21 }
 0x169   : > { %1099 = verf.f32 %v624_v14  ;;  %v625_v1 = vmul.f32 0.70710677, %v1446_v16  ;;  %699 = vadd.xlane.f32.xlu0 %v682_v15  ;;  %v617_v27 = vmul.f32 0.70710677, %v559_v17  ;;  %701 = vadd.xlane.f32.xlu1 %v683_v18  ;;  %v669_v37 = vmul.f32 %v653_v22, %v605_v24 }
 0x16a   : > { %v1090_v23 = vpop.eup %1089  ;;  %v684_v36 = vmul.f32 %v1424_v28, %v661_v29  ;;  %v600_v49 = vmul.f32 0.5, %v556_v2  ;;  %v608_v54 = vmul.f32 0.5, %v588_v3  ;;  %v601_v59 = vmul.f32 0.5, %v559_v17 }
 0x16b   : > { %v1092_v30 = vpop.eup %1091  ;;  %1101 = verf.f32 %v625_v1  ;;  %v646_v6 = vadd.f32 1.0, %v1090_v23  ;;  %v692_v44 = vmul.f32 %v1424_v28, %v669_v37  ;;  %v609_v2 = vmul.f32 0.5, %v1446_v16 }
 0x16c   : > { %1103 = verf.f32 %v617_v27  ;;  %v654_v32 = vadd.f32 1.0, %v1092_v30 }
 0x16d   : > { %v1094_v33 = vpop.eup %1093  ;;  %717 = vadd.xlane.f32.xlu0 %v691_v31  ;;  %v662_v7 = vmul.f32 %v646_v6, %v598_v35  ;;  %703 = vadd.xlane.f32.xlu1 %v684_v36 }
 0x16e   : > { %v1096_v38 = vpop.eup %1095  ;;  %v647_v41 = vadd.f32 1.0, %v1094_v33  ;;  %v670_v43 = vmul.f32 %v654_v32, %v606_v34 }
 0x16f   : > { %v685_v25 = vmul.f32 %v1424_v28, %v662_v7  ;;  %v655_v45 = vadd.f32 1.0, %v1096_v38 }
 0x170   : > { %v663_v46 = vmul.f32 %v647_v41, %v599_v42  ;;  %v693_v50 = vmul.f32 %v1424_v28, %v670_v43 }
 0x171   : > { %705 = vadd.xlane.f32.xlu0 %v685_v25  ;;  %719 = vadd.xlane.f32.xlu1 %v692_v44  ;;  %v671_v56 = vmul.f32 %v655_v45, %v607_v48 }
 0x172   : > { %v1098_v47 = vpop.eup %1097  ;;  %v686_v55 = vmul.f32 %v1424_v28, %v663_v46 }
 0x173   : > { %v1100_v26 = vpop.eup %1099  ;;  %v648_v52 = vadd.f32 1.0, %v1098_v47  ;;  %v694_v61 = vmul.f32 %v1424_v28, %v671_v56 }
 0x174   : > { %v656_v53 = vadd.f32 1.0, %v1100_v26 }
 0x175   : > { %v1102_v39 = vpop.eup %1101  ;;  %721 = vadd.xlane.f32.xlu0 %v693_v50  ;;  %v664_v57 = vmul.f32 %v648_v52, %v600_v49  ;;  %707 = vadd.xlane.f32.xlu1 %v686_v55 }
 0x176   : > { %v1104_v58 = vpop.eup %1103  ;;  %v672_v51 = vmul.f32 %v656_v53, %v608_v54  ;;  %v657_v63 = vadd.f32 1.0, %v1102_v39 }
 0x177   : > { %v687_v60 = vmul.f32 %v1424_v28, %v664_v57  ;;  %v649_v40 = vadd.f32 1.0, %v1104_v58 }
 0x178   : > { %v695_v3 = vmul.f32 %v1424_v28, %v672_v51  ;;  %v673_v5 = vmul.f32 %v657_v63, %v609_v2 }
 0x179   : > { %709 = vadd.xlane.f32.xlu0 %v687_v60  ;;  %v665_v62 = vmul.f32 %v649_v40, %v601_v59  ;;  %723 = vadd.xlane.f32.xlu1 %v694_v61 }
 0x17a   : > { %v696_v8 = vmul.f32 %v1424_v28, %v673_v5 }
 0x17b   : > { %v688_v4 = vmul.f32 %v1424_v28, %v665_v62 }
 0x17d   : > { %725 = vadd.xlane.f32.xlu0 %v695_v3  ;;  %711 = vadd.xlane.f32.xlu1 %v688_v4 }
 0x181   : > { %727 = vadd.xlane.f32.xlu1 %v696_v8 }
 0x1ee   : > { %v698_v10 = vpop.xlane.xlu0 %697 }
 0x1ef   : > { %v736_v28 = vadd.f32 %v894_v9, %v698_v10 }
 0x1f1   : > { %753 = vst.msk [vmem:[%s1474_s17] sm:$0xff] %vm752_vm0, %v736_v28 }
 0x1f2   : > { %v714_v11 = vpop.xlane.xlu0 %713  ;;  %v716_v12 = vpop.xlane.xlu1 %715 }
 0x1f3   : > { %v744_v0 = vadd.f32 %v894_v9, %v714_v11  ;;  %v745_v13 = vadd.f32 %v894_v9, %v716_v12 }
 0x1f5   : > { %761 = vst.msk [vmem:[%s1474_s17 + $0x40] sm:$0xff] %vm752_vm0, %v744_v0  ;;  %762 = vst.msk [vmem:[%s1474_s17 + $0x48] sm:$0xff] %vm752_vm0, %v745_v13 }
 0x1f6   : > { %v700_v14 = vpop.xlane.xlu0 %699  ;;  %v702_v16 = vpop.xlane.xlu1 %701 }
 0x1f7   : > { %v737_v15 = vadd.f32 %v894_v9, %v700_v14  ;;  %v738_v17 = vadd.f32 %v894_v9, %v702_v16 }
 0x1f9   : > { %754 = vst.msk [vmem:[%s1474_s17 + $0x8] sm:$0xff] %vm752_vm0, %v737_v15  ;;  %755 = vst.msk [vmem:[%s1474_s17 + $0x10] sm:$0xff] %vm752_vm0, %v738_v17 }
 0x1fa   : > { %v718_v18 = vpop.xlane.xlu0 %717  ;;  %v704_v20 = vpop.xlane.xlu1 %703 }
 0x1fb   : > { %v746_v19 = vadd.f32 %v894_v9, %v718_v18  ;;  %v739_v21 = vadd.f32 %v894_v9, %v704_v20 }
 0x1fd   : > { %763 = vst.msk [vmem:[%s1474_s17 + $0x50] sm:$0xff] %vm752_vm0, %v746_v19  ;;  %756 = vst.msk [vmem:[%s1474_s17 + $0x18] sm:$0xff] %vm752_vm0, %v739_v21 }
 0x1fe   : > { %v706_v1 = vpop.xlane.xlu0 %705  ;;  %v720_v23 = vpop.xlane.xlu1 %719 }
 0x1ff   : > { %v740_v22 = vadd.f32 %v894_v9, %v706_v1  ;;  %v747_v24 = vadd.f32 %v894_v9, %v720_v23 }
 0x201   : > { %757 = vst.msk [vmem:[%s1474_s17 + $0x20] sm:$0xff] %vm752_vm0, %v740_v22  ;;  %764 = vst.msk [vmem:[%s1474_s17 + $0x58] sm:$0xff] %vm752_vm0, %v747_v24 }
 0x202   : > { %v722_v27 = vpop.xlane.xlu0 %721  ;;  %v708_v30 = vpop.xlane.xlu1 %707 }
 0x203   : > { %v748_v29 = vadd.f32 %v894_v9, %v722_v27  ;;  %v741_v35 = vadd.f32 %v894_v9, %v708_v30 }
 0x205   : > { %765 = vst.msk [vmem:[%s1474_s17 + $0x60] sm:$0xff] %vm752_vm0, %v748_v29  ;;  %758 = vst.msk [vmem:[%s1474_s17 + $0x28] sm:$0xff] %vm752_vm0, %v741_v35 }
 0x206   : > { %v710_v31 = vpop.xlane.xlu0 %709  ;;  %v724_v32 = vpop.xlane.xlu1 %723 }
 0x207   : > { %v742_v6 = vadd.f32 %v894_v9, %v710_v31  ;;  %v749_v33 = vadd.f32 %v894_v9, %v724_v32 }
 0x209   : > { %759 = vst.msk [vmem:[%s1474_s17 + $0x30] sm:$0xff] %vm752_vm0, %v742_v6  ;;  %766 = vst.msk [vmem:[%s1474_s17 + $0x68] sm:$0xff] %vm752_vm0, %v749_v33 }
 0x20a   : > { %v726_v34 = vpop.xlane.xlu0 %725  ;;  %v712_v37 = vpop.xlane.xlu1 %711 }
 0x20b   : > { %v750_v36 = vadd.f32 %v894_v9, %v726_v34  ;;  %v743_v7 = vadd.f32 %v894_v9, %v712_v37 }
 0x20d   : > { %767 = vst.msk [vmem:[%s1474_s17 + $0x70] sm:$0xff] %vm752_vm0, %v750_v36  ;;  %760 = vst.msk [vmem:[%s1474_s17 + $0x38] sm:$0xff] %vm752_vm0, %v743_v7 }
 0x20e   : > { %v728_v38 = vpop.xlane.xlu1 %727 }
 0x20f   : > { %v751_v41 = vadd.f32 %v894_v9, %v728_v38 }
 0x211   : > { %768 = vst.msk [vmem:[%s1474_s17 + $0x78] sm:$0xff] %vm752_vm0, %v751_v41 }
 0x212 PF: > { %s1539_s23 = smov %s1315_s20  ;;  %p18_p6 = scmp.ge.s32.totalorder %s1289_s30, 4  }
 0x213   : > { %s1540_s20 = smov %s1193_s21  ;;  %s1541_s21 = smov %s1197_s22 }
 0x214   : > { %s1542_s22 = smov %s1539_s23  ;;  %s1543_s23 = smov %s1289_s30 }
 0x215   :  { %20 = sbr.rel (!%p18_p6) target bundleno = 7 (0x7), region = 84 }
 0x21c   :  { %791 = vsyncpa [#allocation4], 1 }
 0x21d   :  { %793 = vsyncpa [#allocation4 + $0x1], 1 }
 0x21e   :  { %794 = vsyncpa [#allocation6], 1 }

</bundles_post_ra>
